<compile_context>
chip_gen: v5e
topology: v5e:2x2
jax: 0.10.0
libtpu: 0.0.40
codegen_flags: <defaults>
</compile_context>

<pallas_src>
import functools
import math

import jax
import jax.numpy as jnp
from jax.experimental import pallas as pl
from jax.experimental.pallas import tpu as pltpu

LN_EPS = 1e-5  # PyTorch nn.LayerNorm default


def _round_up(v, m):
    return ((v + m - 1) // m) * m


def _patch_embed_kernel(p_ref, w_ref, b_ref, g_ref, beta_ref, o_ref, *, n_true):
    # p_ref: (tm, Kp)  w_ref: (Kp, Np)  b/g/beta: (1, Np) f32  o_ref: (tm, Np)
    y = jnp.dot(p_ref[...], w_ref[...], preferred_element_type=jnp.float32)
    y = y + b_ref[...]
    # Columns >= n_true of y are exactly zero (zero weight columns, zero bias),
    # so full-width sums equal the true-width sums; just divide by n_true.
    inv_n = jnp.float32(1.0 / n_true)
    s = jnp.sum(y, axis=-1, keepdims=True)
    s2 = jnp.sum(y * y, axis=-1, keepdims=True)
    mean = s * inv_n
    var = s2 * inv_n - mean * mean
    yn = (y - mean) * jax.lax.rsqrt(var + LN_EPS)
    o_ref[...] = (yn * g_ref[...] + beta_ref[...]).astype(o_ref.dtype)


def _extract_patches(x_nchw, kh, kw, stride, pad_h, pad_w, dtype):
    """NCHW image -> (B, Ho, Wo, C*kh*kw) patches; features ordered (C, kh, kw)."""
    # TODO(synk): fuse patch extraction into the kernel (manual DMA over an
    # NHWC image kept in HBM via memory_space=pl.ANY) so the (M, K) patch
    # matrix is never materialized in HBM at all.
    x = jnp.transpose(x_nchw.astype(dtype), (0, 2, 3, 1))      # NHWC
    p = jax.lax.conv_general_dilated_patches(
        x, filter_shape=(kh, kw), window_strides=(stride, stride),
        padding=((pad_h, pad_h), (pad_w, pad_w)),
        dimension_numbers=("NHWC", "HWIO", "NHWC"))
    return p                                                   # (B, Ho, Wo, K)


def overlap_patch_embed(x, conv_w, conv_b, ln_gamma, ln_beta, *, stride,
                        tm=512, compute_dtype=jnp.bfloat16,
                        out_dtype=jnp.float32):
    """x: (B, C, H, W). conv_w: (N, C, kh, kw). Returns ((B, Ho*Wo, N), Ho, Wo)."""
    B = x.shape[0]
    N, C, kh, kw = conv_w.shape

    patches = _extract_patches(x, kh, kw, stride, kh // 2, kw // 2, compute_dtype)
    _, Ho, Wo, K = patches.shape
    M = B * Ho * Wo
    patches = patches.reshape(M, K)

    # M tile: big enough to amortize per-step overhead, but keep >= 2 grid
    # steps whenever possible so v7x's two TensorCores both get work.
    tm_eff = max(8, min(tm, _round_up(M, 8)))
    if -(-M // tm_eff) < 2 and M > 8:
        tm_eff = max(8, _round_up(-(-M // 2), 8))
    M_pad = _round_up(M, tm_eff)

    # Lane-friendly padding of the contraction and feature dims.
    Kp = _round_up(K, 128)
    Np = _round_up(N, 128)

    # One pad pass handles both the M (rows) and K (cols) alignment.
    patches = jnp.pad(patches, ((0, M_pad - M), (0, Kp - K)))

    w2d = conv_w.reshape(N, K).T.astype(compute_dtype)                   # (K, N)
    w2d = jnp.pad(w2d, ((0, Kp - K), (0, Np - N)))                       # (Kp, Np)
    b2d = jnp.pad(conv_b.reshape(1, N).astype(jnp.float32), ((0, 0), (0, Np - N)))
    g2d = jnp.pad(ln_gamma.reshape(1, N).astype(jnp.float32), ((0, 0), (0, Np - N)))
    be2d = jnp.pad(ln_beta.reshape(1, N).astype(jnp.float32), ((0, 0), (0, Np - N)))

    kernel = functools.partial(_patch_embed_kernel, n_true=N)

    out = pl.pallas_call(
        kernel,
        out_shape=jax.ShapeDtypeStruct((M_pad, Np), out_dtype),
        grid_spec=pltpu.PrefetchScalarGridSpec(
            num_scalar_prefetch=0,
            grid=(M_pad // tm_eff,),
            in_specs=[
                pl.BlockSpec((tm_eff, Kp), lambda i: (i, 0)),   # patches tile
                pl.BlockSpec((Kp, Np), lambda i: (0, 0)),       # weights (resident)
                pl.BlockSpec((1, Np), lambda i: (0, 0)),        # bias
                pl.BlockSpec((1, Np), lambda i: (0, 0)),        # LN gamma
                pl.BlockSpec((1, Np), lambda i: (0, 0)),        # LN beta
            ],
            out_specs=pl.BlockSpec((tm_eff, Np), lambda i: (i, 0)),
        ),
        compiler_params=pltpu.CompilerParams(
            dimension_semantics=("parallel",)),
    )(patches, w2d, b2d, g2d, be2d)

    out = out[:M, :N].reshape(B, Ho * Wo, N)
    return out, Ho, Wo


def _reference(x, conv_w, conv_b, ln_gamma, ln_beta, *, stride):
    """Plain-JAX reference mirroring the PyTorch forward (NCHW conv + LN)."""
    kh, kw = conv_w.shape[2], conv_w.shape[3]
    y = jax.lax.conv_general_dilated(
        x, conv_w, window_strides=(stride, stride),
        padding=((kh // 2, kh // 2), (kw // 2, kw // 2)),
        dimension_numbers=("NCHW", "OIHW", "NCHW"))
    y = y + conv_b[None, :, None, None]
    B, N, Ho, Wo = y.shape
    y = y.reshape(B, N, Ho * Wo).transpose(0, 2, 1)            # (B, L, N)
    mean = jnp.mean(y, axis=-1, keepdims=True)
    var = jnp.mean((y - mean) ** 2, axis=-1, keepdims=True)
    y = (y - mean) * jax.lax.rsqrt(var + LN_EPS)
    return y * ln_gamma + ln_beta, Ho, Wo


if __name__ == "__main__":
    # small, conv-consistent shapes: img 16x16, patch 7, stride 4, C=4, D=32
    B, C, H, W = 2, 4, 16, 16
    patch, stride, embed_dim = 7, 4, 32

    key = jax.random.PRNGKey(0)
    kx, kw_ = jax.random.split(key)
    x = jax.random.normal(kx, (B, C, H, W), dtype=jnp.float32)

    # deterministic init matching the module's _init_weights
    fan_out = patch * patch * embed_dim
    conv_w = jax.random.normal(kw_, (embed_dim, C, patch, patch),
                               dtype=jnp.float32) * math.sqrt(2.0 / fan_out)
    conv_b = jnp.zeros((embed_dim,), jnp.float32)
    ln_gamma = jnp.ones((embed_dim,), jnp.float32)
    ln_beta = jnp.zeros((embed_dim,), jnp.float32)

    ref, Hr, Wr = _reference(x, conv_w, conv_b, ln_gamma, ln_beta, stride=stride)

    # f32 streaming path: tight numerical check vs reference.
    out32, Ho, Wo = overlap_patch_embed(
        x, conv_w, conv_b, ln_gamma, ln_beta, stride=stride,
        compute_dtype=jnp.float32)
    out32 = jax.block_until_ready(out32)
    assert (Ho, Wo) == (Hr, Wr)
    assert out32.shape == (B, Ho * Wo, embed_dim)
    assert jnp.allclose(out32, ref, atol=1e-4, rtol=1e-4)

    # bf16 streaming path (default / fast): f32 accumulation + f32 LN epilogue,
    # looser tolerance accounts only for the bf16 input/weight rounding.
    out16, Ho2, Wo2 = overlap_patch_embed(
        x, conv_w, conv_b, ln_gamma, ln_beta, stride=stride)
    out16 = jax.block_until_ready(out16)
    assert (Ho2, Wo2) == (Hr, Wr)
    assert out16.shape == (B, Ho * Wo, embed_dim)
    assert jnp.allclose(out16, ref, atol=5e-2, rtol=5e-2)

    print("KERNEL_OK")
</pallas_src>

<mosaic_0001>
module attributes {stable_mosaic.version = 11 : i64} {
  func.func @_patch_embed_kernel(%arg0: i32, %arg1: memref<16x256xf32, #tpu.memory_space<vmem>>, %arg2: memref<256x128xf32, #tpu.memory_space<vmem>>, %arg3: memref<1x128xf32, #tpu.memory_space<vmem>>, %arg4: memref<1x128xf32, #tpu.memory_space<vmem>>, %arg5: memref<1x128xf32, #tpu.memory_space<vmem>>, %arg6: memref<16x128xf32, #tpu.memory_space<vmem>>) attributes {dimension_semantics = [#tpu.dimension_semantics<parallel>], iteration_bounds = array<i64: 2>, scalar_prefetch = 0 : i64, scratch_operands = 0 : i64, tpu.core_type = #tpu.core_type<tc>, window_params = [{transform_indices = @transform_0, window_bounds = array<i64: 16, 256>}, {pipeline_mode = #tpu.pipeline_mode<synchronous>, transform_indices = @transform_1, window_bounds = array<i64: 256, 128>}, {pipeline_mode = #tpu.pipeline_mode<synchronous>, transform_indices = @transform_2, window_bounds = array<i64: 1, 128>}, {pipeline_mode = #tpu.pipeline_mode<synchronous>, transform_indices = @transform_3, window_bounds = array<i64: 1, 128>}, {pipeline_mode = #tpu.pipeline_mode<synchronous>, transform_indices = @transform_4, window_bounds = array<i64: 1, 128>}, {transform_indices = @transform_5, window_bounds = array<i64: 16, 128>}]} {
    %c0 = arith.constant 0 : index
    %c0_0 = arith.constant 0 : index
    %0 = vector.load %arg1[%c0, %c0_0] : memref<16x256xf32, #tpu.memory_space<vmem>>, vector<16x256xf32>
    %c0_1 = arith.constant 0 : index
    %c0_2 = arith.constant 0 : index
    %1 = vector.load %arg2[%c0_1, %c0_2] : memref<256x128xf32, #tpu.memory_space<vmem>>, vector<256x128xf32>
    %cst = arith.constant dense<0.000000e+00> : vector<16x128xf32>
    %2 = tpu.matmul %0, %1, %cst {dimension_numbers = #tpu.dot_dimension_numbers<[1], [0], [0], [1], [0, 0, 1, 1], [], []>} : vector<16x256xf32>, vector<256x128xf32>, vector<16x128xf32> -> vector<16x128xf32>
    %c0_3 = arith.constant 0 : index
    %c0_4 = arith.constant 0 : index
    %3 = vector.load %arg3[%c0_3, %c0_4] : memref<1x128xf32, #tpu.memory_space<vmem>>, vector<1x128xf32>
    %4 = vector.broadcast %3 : vector<1x128xf32> to vector<16x128xf32>
    %5 = arith.addf %2, %4 : vector<16x128xf32>
    %cst_5 = arith.constant dense<0.000000e+00> : vector<16xf32>
    %6 = vector.multi_reduction <add>, %5, %cst_5 [1] : vector<16x128xf32> to vector<16xf32>
    %7 = vector.shape_cast %6 : vector<16xf32> to vector<16x1xf32>
    %8 = arith.mulf %5, %5 : vector<16x128xf32>
    %cst_6 = arith.constant dense<0.000000e+00> : vector<16xf32>
    %9 = vector.multi_reduction <add>, %8, %cst_6 [1] : vector<16x128xf32> to vector<16xf32>
    %10 = vector.shape_cast %9 : vector<16xf32> to vector<16x1xf32>
    %cst_7 = arith.constant 3.125000e-02 : f32
    %11 = vector.broadcast %cst_7 : f32 to vector<16x1xf32>
    %12 = arith.mulf %7, %11 : vector<16x1xf32>
    %cst_8 = arith.constant 3.125000e-02 : f32
    %13 = vector.broadcast %cst_8 : f32 to vector<16x1xf32>
    %14 = arith.mulf %10, %13 : vector<16x1xf32>
    %15 = arith.mulf %12, %12 : vector<16x1xf32>
    %16 = arith.subf %14, %15 : vector<16x1xf32>
    %17 = vector.broadcast %12 : vector<16x1xf32> to vector<16x128xf32>
    %18 = arith.subf %5, %17 : vector<16x128xf32>
    %cst_9 = arith.constant 9.99999974E-6 : f32
    %19 = vector.broadcast %cst_9 : f32 to vector<16x1xf32>
    %20 = arith.addf %16, %19 : vector<16x1xf32>
    %21 = math.rsqrt %20 : vector<16x1xf32>
    %22 = vector.broadcast %21 : vector<16x1xf32> to vector<16x128xf32>
    %23 = arith.mulf %18, %22 : vector<16x128xf32>
    %c0_10 = arith.constant 0 : index
    %c0_11 = arith.constant 0 : index
    %24 = vector.load %arg4[%c0_10, %c0_11] : memref<1x128xf32, #tpu.memory_space<vmem>>, vector<1x128xf32>
    %25 = vector.broadcast %24 : vector<1x128xf32> to vector<16x128xf32>
    %26 = arith.mulf %23, %25 : vector<16x128xf32>
    %c0_12 = arith.constant 0 : index
    %c0_13 = arith.constant 0 : index
    %27 = vector.load %arg5[%c0_12, %c0_13] : memref<1x128xf32, #tpu.memory_space<vmem>>, vector<1x128xf32>
    %28 = vector.broadcast %27 : vector<1x128xf32> to vector<16x128xf32>
    %29 = arith.addf %26, %28 : vector<16x128xf32>
    %c0_14 = arith.constant 0 : index
    %c0_15 = arith.constant 0 : index
    %30 = vector.load %arg6[%c0_14, %c0_15] : memref<16x128xf32, #tpu.memory_space<vmem>>, vector<16x128xf32>
    tpu.vector_store %arg6[%c0_14, %c0_15], %29 {strides = array<i32>} : memref<16x128xf32, #tpu.memory_space<vmem>>, vector<16x128xf32>,
    return
  }
  func.func @transform_0(%arg0: i32) -> (i32, i32) {
    %c0_i32 = arith.constant 0 : i32
    %c0_i32_0 = arith.constant 0 : i32
    return %arg0, %c0_i32 : i32, i32
  }
  func.func @transform_1(%arg0: i32) -> (i32, i32) {
    %c0_i32 = arith.constant 0 : i32
    %c0_i32_0 = arith.constant 0 : i32
    %c0_i32_1 = arith.constant 0 : i32
    return %c0_i32, %c0_i32_0 : i32, i32
  }
  func.func @transform_2(%arg0: i32) -> (i32, i32) {
    %c0_i32 = arith.constant 0 : i32
    %c0_i32_0 = arith.constant 0 : i32
    %c0_i32_1 = arith.constant 0 : i32
    return %c0_i32, %c0_i32_0 : i32, i32
  }
  func.func @transform_3(%arg0: i32) -> (i32, i32) {
    %c0_i32 = arith.constant 0 : i32
    %c0_i32_0 = arith.constant 0 : i32
    %c0_i32_1 = arith.constant 0 : i32
    return %c0_i32, %c0_i32_0 : i32, i32
  }
  func.func @transform_4(%arg0: i32) -> (i32, i32) {
    %c0_i32 = arith.constant 0 : i32
    %c0_i32_0 = arith.constant 0 : i32
    %c0_i32_1 = arith.constant 0 : i32
    return %c0_i32, %c0_i32_0 : i32, i32
  }
  func.func @transform_5(%arg0: i32) -> (i32, i32) {
    %c0_i32 = arith.constant 0 : i32
    %c0_i32_0 = arith.constant 0 : i32
    return %arg0, %c0_i32 : i32, i32
  }
}

</mosaic_0001>

<bundles_post_ra>
// kernel: tpu_custom_call.1
= control target key start
LH: loop header
LB: loop body
LE: loop exit
PB: predicated region body
PF: predicated region fallthrough
CT: control target
= control target key end

     0   :  { %10 = vsyncpa [#allocation3], 0  ;;  %s955_s0 = inlined_call_operand.hbm [shape: f32[32,256], index: 0, kind: input, shape index: {}]   ;;  %s956_s1 = inlined_call_operand.hbm [shape: f32[256,128], index: 1, kind: input, shape index: {}]   ;;  %s957_s2 = inlined_call_operand.vmem [shape: f32[1,128], index: 2, kind: input, shape index: {}]   ;;  %s958_s3 = inlined_call_operand.vmem [shape: f32[1,128], index: 3, kind: input, shape index: {}]   ;;  %s959_s4 = inlined_call_operand.vmem [shape: f32[1,128], index: 4, kind: input, shape index: {}]   ;;  %s960_s5 = inlined_call_operand.hbm [shape: f32[32,128], index: 5, kind: output, shape index: {}]  }
   0x1   :  { %12 = vsyncpa [#allocation3 + $0x1], 0 }
   0x2   :  { %13 = vsyncpa [#allocation6], 0 }
   0x3   :  { %14 = vsyncpa [#allocation4], 0 }
   0x4   :  { %16 = vsyncpa [#allocation4 + $0x1], 0  ;;  %s799_s18 = smov 0   ;;  %s801_s19 = smov 0  }
   0x5   :  { %s803_s20 = smov 0   ;;  %s805_s21 = smov 0  }
   0x6 LB: > { %s820_s22 = sadd.s32 4294967295, %s760_s21   ;;  %s508_s23 = sadd.s32 4294967294, %s760_s21   ;;  %s760_s21 = sphi %s805_s21, %s970_s21   ;;  %s756_s20 = sphi %s803_s20, %s969_s20   ;;  %s752_s19 = sphi %s801_s19, %s968_s19   ;;  %s748_s18 = sphi %s799_s18, %s967_s18  }
   0x7   : > { %p42_p0 = scmp.ne.s32.totalorder %s752_s19, %s748_s18  ;;  %p43_p1 = scmp.eq.s32.totalorder %s820_s22, 0 }
   0x8   : > { %p150_p2 = scmp.eq.s32.totalorder %s820_s22, 1  ;;  %p156_p3 = scmp.eq.s32.totalorder %s508_s23, 1 }
   0x9   : > { %p829_p4 = por %p43_p1, %p42_p0  ;;  %p509_p5 = scmp.ge.s32.totalorder %s760_s21, 1 }
   0xa   : > { %p834_p6 = por %p156_p3, %p42_p0  ;;  %p163_p7 = scmp.lt.s32.totalorder %s760_s21, 3 }
   0xb   : > { %s174_s28 = sshll.u32 %s956_s1, 4  ;;  %s762_s30 = smov [#allocation5]   ;;  %s175_s28 = int_to_ptr.hbm [resolvable:$true] %s174_s28 }
   0xc   : > { %p842_p8 = pnand %p509_p5, %p163_p7  ;;  %s176_s6 = sshll.u32 %s762_s30, 4  ;;  %s177_s6 = int_to_ptr.vmem [resolvable:$true] %s176_s6 }
   0xd   : > { %s852_s7 = sadd.s32 1, %s760_s21   ;;  %s763_s8 = smov 128  }
   0xe   : > { %p568_p9 = pneg %p842_p8  ;;  %s764_s9 = smov 8  }
   0xf   : > { %s26_s10 = ssub.s32 %s760_s21, %s852_s7  ;;  %s29_s11 = sadd.s32 1, %s756_s20 }
  0x10   : > { %p569_p10 = pnand %p568_p9, %p43_p1  ;;  %p27_p12 = scmp.eq.s32.totalorder %s26_s10, 0 }
  0x11   : > { %p36_p13 = scmp.ne.s32.totalorder %s756_s20, %s752_s19  ;;  %p37_p0 = scmp.eq.s32.totalorder %s760_s21, 0 }
  0x12   : > { %571 = dma.hbm_to_vmem [thread:$0]  (!%p569_p10), %s175_s28, 4096, %s177_s6, [#allocation6], %s763_s8, %s763_s8, %s764_s9  }
  0x13   : > { %p581_p3 = scmp.lt.s32.totalorder %s760_s21, 2  ;;  %p38_p5 = por %p37_p0, %p36_p13 }
  0x14   : > { %s862_s12 = scalar_select %p27_p12, %s756_s20, %s29_s11  }
  0x15   : > { %p866_p7 = por %p150_p2, %p36_p13  ;;  %s199_s14 = sand.u32 1, %s756_s20  }
  0x16   : > { %s526_s15 = sshll.u32 %s760_s21, 5  ;;  %s512_s16 = sshll.u32 %s199_s14, 5 }
  0x17   : > { %s209_s26 = scalar_lea.hbm %s955_s0, %s526_s15  ;;  %s203_s28 = scalar_lea.vmem [#allocation2], %s512_s16 }
  0x18   : > { %s210_s27 = sshll.u32 %s209_s26, 4  ;;  %s212_s30 = sshll.u32 %s203_s28, 4  ;;  %s211_s27 = int_to_ptr.hbm [resolvable:$true] %s210_s27  ;;  %s213_s30 = int_to_ptr.vmem [resolvable:$true] %s212_s30 }
  0x19   : > { %p877_p9 = pnand %p581_p3, %p38_p5  ;;  %s200_s8 = scalar_lea.sflag [#allocation3], %s199_s14 }
  0x1a   : > { %s660_s9 = sshra.s32 %s211_s27, 4  ;;  %s667_s16 = scalar_lea.hbm %s955_s0, 64  ;;  %s661_s9 = int_to_ptr.hbm [resolvable:$true] %s660_s9 }
  0x1b   : > { %s662_s10 = scalar_lea.hbm %s661_s9, 32  ;;  %p664_p10 = pneg %p877_p9 }
  0x1c   : > { %p663_p2 = scmp.ne.s32.totalorder %s661_s9, %s662_s10  ;;  %p668_p0 = scmp.lt.s32.totalorder %s661_s9, %s955_s0 }
  0x1d   : > { %p669_p3 = scmp.lt.s32.totalorder %s667_s16, %s662_s10 }
  0x1e   : > { %p665_p12 = pnand %p664_p10, %p663_p2 }
  0x1f   : > { %p670_p5 = por %p669_p3, %p668_p0 }
  0x20   : > { %p666_p13 = pneg %p665_p12 }
  0x22   : > { %p671_p11 = pnand %p670_p5, %p666_p13 }
  0x24   : > { %674 = shalt.err (!%p671_p11)
}
  0x25   : > { %s765_s14 = smov 256   ;;  %s766_s26 = smov 16  }
  0x26   : > { %575 = dma.hbm_to_vmem [thread:$0]  (!%p877_p9), %s211_s27, 512, %s213_s30, %s200_s8, %s765_s14, %s765_s14, %s766_s26  }
  0x27   : > { %224 = sbr.rel (%p842_p8) target bundleno = 369 (0x171), region = 40  ;;  %s894_s28 = sand.u32 (!%p842_p8), 1, %s752_s19  }
  0x28   : > { %s517_s11 = sshll.u32 (!%p842_p8), %s894_s28, 5  ;;  %s227_s9 = scalar_lea.sflag (!%p842_p8), [#allocation3], %s894_s28 }
  0x29   : > { %s898_s10 = scalar_lea.vmem (!%p842_p8), [#allocation2], %s517_s11 }
  0x2c   : > { %735 = dma.done.wait (%p829_p4), %s227_s9, 512  }
  0x2d   : > { %737 = vsyncadd (%p829_p4), %s227_s9, 4294966784 }
  0x2e   : > { %739 = dma.done.wait (%p43_p1), [#allocation6], 4096  }
  0x2f   : > { %741 = vsyncadd (%p43_p1), [#allocation6], 4294963200  ;;  %v284_v0 = vld [vmem:[#allocation5 + $0x78] sm:$0xff]  ;;  %v283_v1 = vld [vmem:[#allocation5 + $0x70] sm:$0xff]  ;;  %s519_s15 = sshll.u32 %s894_s28, 4  ;;  %s527_s16 = sshll.u32 %s820_s22, 4 }
  0x30   : > { %v300_v2 = vld [vmem:[#allocation5 + $0xf8] sm:$0xff]  ;;  %305 = vmatpush.msra.mxu0 %v284_v0  ;;  %528 = vmatpush.msra.mxu2 %v284_v0  ;;  %v299_v3 = vld [vmem:[#allocation5 + $0xf0] sm:$0xff]  ;;  %v282_v4 = vld [vmem:[#allocation5 + $0x68] sm:$0xff]  ;;  %s421_s14 = scalar_lea.hbm %s960_s5, %s527_s16  ;;  %s262_s26 = scalar_lea.vmem [#allocation7], %s519_s15 }
  0x31   : > { %328 = vmatpush.msra.mxu1 %v300_v2  ;;  %544 = vmatpush.msra.mxu3 %v300_v2  ;;  %v298_v5 = vld [vmem:[#allocation5 + $0xe8] sm:$0xff]  ;;  %v281_v6 = vld [vmem:[#allocation5 + $0x60] sm:$0xff]  ;;  %v280_v8 = vld [vmem:[#allocation5 + $0x58] sm:$0xff]  ;;  %s422_s11 = sshll.u32 %s262_s26, 4  ;;  %s424_s9 = sshll.u32 %s421_s14, 4  ;;  %s423_s11 = int_to_ptr.vmem [resolvable:$true] %s422_s11  ;;  %s425_s9 = int_to_ptr.hbm [resolvable:$true] %s424_s9 }
  0x32   : > { %306 = vmatpush.msra.mxu0 %v283_v1  ;;  %529 = vmatpush.msra.mxu2 %v283_v1  ;;  %v297_v7 = vld [vmem:[#allocation5 + $0xe0] sm:$0xff]  ;;  %v296_v9 = vld [vmem:[#allocation5 + $0xd8] sm:$0xff]  ;;  %v279_v10 = vld [vmem:[#allocation5 + $0x50] sm:$0xff]  ;;  %s410_s22 = scalar_lea.sflag [#allocation4], %s894_s28  ;;  %s710_s30 = scalar_lea.hbm %s960_s5, 32 }
  0x33   : > { %329 = vmatpush.msra.mxu1 %v299_v3  ;;  %545 = vmatpush.msra.mxu3 %v299_v3  ;;  %v295_v11 = vld [vmem:[#allocation5 + $0xd0] sm:$0xff]  ;;  %v278_v12 = vld [vmem:[#allocation5 + $0x48] sm:$0xff]  ;;  %v277_v14 = vld [vmem:[#allocation5 + $0x40] sm:$0xff] }
  0x34   : > { %307 = vmatpush.msra.mxu0 %v282_v4  ;;  %530 = vmatpush.msra.mxu2 %v282_v4  ;;  %v294_v13 = vld [vmem:[#allocation5 + $0xc8] sm:$0xff]  ;;  %v293_v15 = vld [vmem:[#allocation5 + $0xc0] sm:$0xff]  ;;  %v276_v16 = vld [vmem:[#allocation5 + $0x38] sm:$0xff] }
  0x35   : > { %330 = vmatpush.msra.mxu1 %v298_v5  ;;  %546 = vmatpush.msra.mxu3 %v298_v5  ;;  %v292_v17 = vld [vmem:[#allocation5 + $0xb8] sm:$0xff]  ;;  %v275_v18 = vld [vmem:[#allocation5 + $0x30] sm:$0xff]  ;;  %v274_v20 = vld [vmem:[#allocation5 + $0x28] sm:$0xff] }
  0x36   : > { %308 = vmatpush.msra.mxu0 %v281_v6  ;;  %531 = vmatpush.msra.mxu2 %v281_v6  ;;  %v291_v19 = vld [vmem:[#allocation5 + $0xb0] sm:$0xff]  ;;  %v290_v21 = vld [vmem:[#allocation5 + $0xa8] sm:$0xff]  ;;  %v273_v22 = vld [vmem:[#allocation5 + $0x20] sm:$0xff] }
  0x37   : > { %331 = vmatpush.msra.mxu1 %v297_v7  ;;  %547 = vmatpush.msra.mxu3 %v297_v7  ;;  %v289_v23 = vld [vmem:[#allocation5 + $0xa0] sm:$0xff]  ;;  %v272_v24 = vld [vmem:[#allocation5 + $0x18] sm:$0xff]  ;;  %v271_v26 = vld [vmem:[#allocation5 + $0x10] sm:$0xff] }
  0x38   : > { %309 = vmatpush.msra.mxu0 %v280_v8  ;;  %532 = vmatpush.msra.mxu2 %v280_v8  ;;  %v288_v25 = vld [vmem:[#allocation5 + $0x98] sm:$0xff]  ;;  %v287_v27 = vld [vmem:[#allocation5 + $0x90] sm:$0xff]  ;;  %v270_v28 = vld [vmem:[#allocation5 + $0x8] sm:$0xff] }
  0x39   : > { %332 = vmatpush.msra.mxu1 %v296_v9  ;;  %548 = vmatpush.msra.mxu3 %v296_v9  ;;  %v286_v29 = vld [vmem:[#allocation5 + $0x88] sm:$0xff]  ;;  %v269_v30 = vld [vmem:[#allocation5] sm:$0xff]  ;;  %v267_v33 = vld [vmem:[%s898_s10 + $0x10] sm:$0xff] }
  0x3a   : > { %310 = vmatpush.msra.mxu0 %v279_v10  ;;  %533 = vmatpush.msra.mxu2 %v279_v10  ;;  %v265_v31 = vld [vmem:[%s898_s10] sm:$0xff]  ;;  %v266_v34 = vld [vmem:[%s898_s10 + $0x8] sm:$0xff]  ;;  %v268_v35 = vld [vmem:[%s898_s10 + $0x18] sm:$0xff]  ;;  %s704_s10 = sshra.s32 %s425_s9, 4  ;;  %s705_s10 = int_to_ptr.hbm [resolvable:$true] %s704_s10 }
  0x3b   : > { %333 = vmatpush.msra.mxu1 %v295_v11  ;;  %549 = vmatpush.msra.mxu3 %v295_v11  ;;  %v285_v32 = vld [vmem:[#allocation5 + $0x80] sm:$0xff]  ;;  %s706_s24 = scalar_lea.hbm %s705_s10, 16  ;;  %p711_p11 = scmp.lt.s32.totalorder %s705_s10, %s960_s5 }
  0x3c   : > { %311 = vmatpush.msra.mxu0 %v278_v12  ;;  %534 = vmatpush.msra.mxu2 %v278_v12  ;;  %v623_v36 = vld [vmem:[%s957_s2] ss:$0 sm:$0xff]  ;;  %p707_p1 = scmp.ne.s32.totalorder %s705_s10, %s706_s24  ;;  %p712_p9 = scmp.lt.s32.totalorder %s710_s30, %s706_s24 }
  0x3d   : > { %334 = vmatpush.msra.mxu1 %v294_v13  ;;  %550 = vmatpush.msra.mxu3 %v294_v13  ;;  %v624_v6 = vld [vmem:[%s958_s3] ss:$0 sm:$0xff] }
  0x3e   : > { %312 = vmatpush.msra.mxu0 %v277_v14  ;;  %535 = vmatpush.msra.mxu2 %v277_v14  ;;  %v625_v9 = vld [vmem:[%s959_s4] ss:$0 sm:$0xff]  ;;  %p708_p4 = pnand %p707_p1, %p866_p7  ;;  %p713_p2 = por %p712_p9, %p711_p11 }
  0x3f   : > { %335 = vmatpush.msra.mxu1 %v293_v15  ;;  %551 = vmatpush.msra.mxu3 %v293_v15 }
  0x40   : > { %313 = vmatpush.msra.mxu0 %v276_v16  ;;  %536 = vmatpush.msra.mxu2 %v276_v16  ;;  %p709_p8 = pneg %p708_p4 }
  0x41   : > { %336 = vmatpush.msra.mxu1 %v292_v17  ;;  %552 = vmatpush.msra.mxu3 %v292_v17 }
  0x42   : > { %314 = vmatpush.msra.mxu0 %v275_v18  ;;  %537 = vmatpush.msra.mxu2 %v275_v18  ;;  %p714_p10 = pnand %p713_p2, %p709_p8 }
  0x43   : > { %337 = vmatpush.msra.mxu1 %v291_v19  ;;  %553 = vmatpush.msra.mxu3 %v291_v19 }
  0x44   : > { %315 = vmatpush.msra.mxu0 %v274_v20  ;;  %538 = vmatpush.msra.mxu2 %v274_v20 }
  0x45   : > { %338 = vmatpush.msra.mxu1 %v290_v21  ;;  %554 = vmatpush.msra.mxu3 %v290_v21 }
  0x46   : > { %316 = vmatpush.msra.mxu0 %v273_v22  ;;  %539 = vmatpush.msra.mxu2 %v273_v22 }
  0x47   : > { %339 = vmatpush.msra.mxu1 %v289_v23  ;;  %555 = vmatpush.msra.mxu3 %v289_v23 }
  0x48   : > { %317 = vmatpush.msra.mxu0 %v272_v24  ;;  %540 = vmatpush.msra.mxu2 %v272_v24 }
  0x49   : > { %340 = vmatpush.msra.mxu1 %v288_v25  ;;  %556 = vmatpush.msra.mxu3 %v288_v25 }
  0x4a   : > { %318 = vmatpush.msra.mxu0 %v271_v26  ;;  %541 = vmatpush.msra.mxu2 %v271_v26 }
  0x4b   : > { %341 = vmatpush.msra.mxu1 %v287_v27  ;;  %557 = vmatpush.msra.mxu3 %v287_v27 }
  0x4c   : > { %319 = vmatpush.msra.mxu0 %v270_v28  ;;  %542 = vmatpush.msra.mxu2 %v270_v28 }
  0x4d   : > { %342 = vmatpush.msra.mxu1 %v286_v29  ;;  %558 = vmatpush.msra.mxu3 %v286_v29 }
  0x4e   : > { %320 = vmatpush.msra.mxu0 %v269_v30  ;;  %543 = vmatpush.msra.mxu2 %v269_v30 }
  0x4f   : > { %321 = vmatmul.f32.vlgmr.msra.gmra.mxu0 %v265_v31  ;;  %343 = vmatpush.msra.mxu1 %v285_v32 }
  0x50   : > { %324 = vmatmul.f32.vlgmr.msra.gmra.mxu2 %v267_v33  ;;  %344 = vmatmul.f32.vlgmr.msra.gmra.mxu1 %v266_v34 }
  0x51   : > { %559 = vmatpush.msra.mxu3 %v285_v32 }
  0x52   : > { %347 = vmatmul.f32.vlgmr.msra.gmra.mxu3 %v268_v35 }
  0xcc   : > { %v322_v37 = vpop.f32.mrf.mxu0 }
  0xcd   : > { %v323_v38 = vadd.f32 %v623_v36, %v322_v37  ;;  %v345_v39 = vpop.f32.mrf.mxu1 }
  0xcf   : > { %v346_v40 = vadd.f32 %v345_v39, %v323_v38 }
  0xd1   : > { %351 = vadd.xlane.f32.xlu0 %v346_v40  ;;  %v355_v41 = vmul.f32 %v346_v40, %v346_v40 }
  0xd3   : > { %357 = vadd.xlane.f32.xlu1 %v355_v41  ;;  %v325_v42 = vpop.f32.mrf.mxu2 }
  0xd4   : > { %v326_v43 = vadd.f32 %v623_v36, %v325_v42 }
  0xd5   : > { %v348_v44 = vpop.f32.mrf.mxu3 }
  0xd6   : > { %v349_v45 = vadd.f32 %v348_v44, %v326_v43 }
  0xd8   : > { %v356_v46 = vmul.f32 %v349_v45, %v349_v45 }
  0xd9   : > { %353 = vadd.xlane.f32.xlu0 %v349_v45 }
  0xdb   : > { %359 = vadd.xlane.f32.xlu1 %v356_v46 }
 0x144   : > { %v352_v47 = vpop.xlane.xlu0 %351 }
 0x145   : > { %v361_v48 = vmul.f32 0.03125, %v352_v47 }
 0x146   : > { %v358_v49 = vpop.xlane.xlu1 %357 }
 0x147   : > { %v365_v50 = vmul.f32 %v361_v48, %v361_v48  ;;  %v363_v51 = vmul.f32 0.03125, %v358_v49  ;;  %v369_v5 = vsub.f32 %v346_v40, %v361_v48 }
 0x149   : > { %v367_v52 = vsub.f32 %v363_v51, %v365_v50 }
 0x14b   : > { %v371_v53 = vadd.f32 1e-05, %v367_v52 }
 0x14c   : > { %v354_v54 = vpop.xlane.xlu0 %353 }
 0x14d   : > { %626 = vrsqrt.f32 %v371_v53  ;;  %v362_v55 = vmul.f32 0.03125, %v354_v54  ;;  %vm379_vm1 = vweird.f32 %v371_v53 }
 0x14e   : > { %v360_v56 = vpop.xlane.xlu1 %359 }
 0x14f   : > { %v366_v57 = vmul.f32 %v362_v55, %v362_v55  ;;  %v364_v58 = vmul.f32 0.03125, %v360_v56  ;;  %v370_v16 = vsub.f32 %v349_v45, %v362_v55 }
 0x151   : > { %v368_v59 = vsub.f32 %v364_v58, %v366_v57 }
 0x153   : > { %v627_v60 = vpop.eup %626  ;;  %v372_v61 = vadd.f32 1e-05, %v368_v59 }
 0x154   : > { %v374_v62 = vmul.f32 %v627_v60, %v371_v53  ;;  %vm380_vm0 = vweird.f32 %v627_v60 }
 0x155   : > { %628 = vrsqrt.f32 %v372_v61  ;;  %vm381_vm2 = vmor %vm379_vm1, %vm380_vm0  ;;  %vm389_vm4 = vweird.f32 %v372_v61 }
 0x156   : > { %v375_v63 = vmul.f32 %v627_v60, %v374_v62 }
 0x158   : > { %v376_v0 = vmul.f32 0.5, %v375_v63 }
 0x15a   : > { %v377_v1 = vsub.f32 1.5, %v376_v0 }
 0x15b   : > { %v629_v2 = vpop.eup %628 }
 0x15c   : > { %v378_v3 = vmul.f32 %v627_v60, %v377_v1  ;;  %v384_v4 = vmul.f32 %v629_v2, %v372_v61  ;;  %vm390_vm3 = vweird.f32 %v629_v2 }
 0x15d   : > { %vm391_vm5 = vmor %vm389_vm4, %vm390_vm3 }
 0x15e   : > { %v382_v7 = vsel %vm381_vm2, %v627_v60, %v378_v3  ;;  %v385_v8 = vmul.f32 %v629_v2, %v384_v4 }
 0x15f   : > { %v393_v10 = vmul.f32 %v382_v7, %v369_v5 }
 0x160   : > { %v386_v11 = vmul.f32 0.5, %v385_v8 }
 0x161   : > { %v399_v12 = vmul.f32 %v624_v6, %v393_v10 }
 0x162   : > { %v387_v13 = vsub.f32 1.5, %v386_v11 }
 0x163   : > { %v405_v14 = vadd.f32 %v625_v9, %v399_v12 }
 0x164   : > { %v388_v15 = vmul.f32 %v629_v2, %v387_v13 }
 0x165   : > { %407 = vst [vmem:[%s262_s26] sm:$0xff] %v405_v14 }
 0x166   : > { %v392_v17 = vsel %vm391_vm5, %v629_v2, %v388_v15 }
 0x167   : > { %v394_v18 = vmul.f32 %v392_v17, %v370_v16 }
 0x169   : > { %v400_v19 = vmul.f32 %v624_v6, %v394_v18 }
 0x16b   : > { %v406_v20 = vadd.f32 %v625_v9, %v400_v19 }
 0x16d   : > { %408 = vst [vmem:[%s262_s26 + $0x8] sm:$0xff] %v406_v20 }
 0x16e   : > { %717 = shalt.err (!%p714_p10)
}
 0x16f   : > { %s767_s28 = smov 128   ;;  %s768_s15 = smov 8  }
 0x170   : > { %566 = dma.vmem_to_hbm [thread:$0]  (%p866_p7), %s423_s11, 256, %s425_s9, %s410_s22, %s767_s28, %s767_s28, %s768_s15  }
 0x171 PF: > { %s439_s16 = sand.u32 1, %s748_s18   ;;  %p966_p12 = scmp.ge.s32.totalorder %s760_s21, 2 }
 0x172   : > { %s440_s17 = scalar_lea.sflag [#allocation4], %s439_s16 }
 0x173   : > { %p577_p13 = pnand %p966_p12, %p834_p6 }
 0x175   : > { %p578_p0 = pneg %p577_p13 }
 0x177   : > { %743 = dma.done.wait (%p578_p0), %s440_s17, 256  }
 0x178   : > { %745 = vsyncadd (%p578_p0), %s440_s17, 4294967040  ;;  %p19_p3 = scmp.ge.s32.totalorder %s852_s7, 4   ;;  %s967_s18 = smov %s752_s19 }
 0x179   : > { %s968_s19 = smov %s756_s20  ;;  %s969_s20 = smov %s862_s12 }
 0x17a   : > { %s970_s21 = smov %s852_s7  ;;  %21 = sbr.rel (!%p19_p3) target bundleno = 6 (0x6), region = 89 }
 0x17f   :  { %446 = vsyncpa [#allocation3], 1 }
 0x180   :  { %448 = vsyncpa [#allocation3 + $0x1], 1 }
 0x181   :  { %449 = vsyncpa [#allocation6], 1 }
 0x182   :  { %450 = vsyncpa [#allocation4], 1 }
 0x183   :  { %452 = vsyncpa [#allocation4 + $0x1], 1 }

</bundles_post_ra>
